<compile_context>
chip_gen: v6e
topology: v6e:2x2x1
jax: 0.10.0
libtpu: 0.0.40
codegen_flags: <defaults>
</compile_context>

<pallas_src>
import functools

import jax
import jax.numpy as jnp
from jax.experimental import pallas as pl
from jax.experimental.pallas import tpu as pltpu


def _round_up(a, b):
    return ((a + b - 1) // b) * b


def _ce_weight_kernel(n_rows, tile_n, inner, x_ref, t_ref, w_ref, num_ref, den_ref):
    i = pl.program_id(0)      # TensorCore-parallel shard of the batch
    j = pl.program_id(1)      # sequential reduction over row tiles

    @pl.when(j == 0)
    def _():
        num_ref[...] = jnp.zeros_like(num_ref)
        den_ref[...] = jnp.zeros_like(den_ref)

    x = x_ref[...].astype(jnp.float32)   # (C, tile_n) logits, lane-dense, cast in-kernel
    t = t_ref[...]                       # (1, tile_n) int32 targets
    w = w_ref[...].astype(jnp.float32)   # (C, 1)      per-class weights

    # Row-validity mask: padded batch columns contribute nothing.
    lane = jax.lax.broadcasted_iota(jnp.int32, (1, tile_n), 1)
    row0 = (i * inner + j) * tile_n
    valid = (row0 + lane) < n_rows                                       # (1, tile_n)

    # Numerically stable log-sum-exp over the class (sublane) axis.
    m = jnp.max(x, axis=0, keepdims=True)                                # (1, tile_n)
    lse = m + jnp.log(jnp.sum(jnp.exp(x - m), axis=0, keepdims=True))    # (1, tile_n)

    # Gather target logit and its class weight via a one-hot mask (VPU friendly;
    # invalid / out-of-range targets produce an all-zero one-hot -> w_i = 0).
    cls_ids = jax.lax.broadcasted_iota(jnp.int32, x.shape, 0)            # (C, tile_n)
    onehot = (cls_ids == t).astype(jnp.float32)                          # (C, tile_n)
    tgt_logit = jnp.sum(x * onehot, axis=0, keepdims=True)               # (1, tile_n)
    w_i = jnp.sum(onehot * w, axis=0, keepdims=True)                     # (1, tile_n)
    w_i = jnp.where(valid, w_i, 0.0)

    nll = lse - tgt_logit                                                # (1, tile_n)

    # Lane-wise f32 partial sums accumulated in the output block (VMEM-resident
    # across j thanks to the constant output block index along the j axis).
    num_ref[...] += (w_i * nll)[None]                                    # (1, 1, tile_n)
    den_ref[...] += w_i[None]


@functools.partial(jax.jit, static_argnames=("tile_n", "num_cores"))
def weighted_cross_entropy_pallas(x, target, per_cls_weight, tile_n=8192, num_cores=2):
    """x: [N, C] logits (any float dtype), target: [N] int class ids,
    per_cls_weight: [C] f32.  Returns the weighted-mean cross-entropy scalar."""
    N, C = x.shape

    per_core = pl.cdiv(N, num_cores)
    tile = min(tile_n, _round_up(per_core, 128))
    tile = _round_up(tile, 128)
    inner = pl.cdiv(per_core, tile)
    n_pad = num_cores * inner * tile

    # Lane-dense layout: batch on the 128-lane axis.  Native dtype is DMA'd;
    # the f32 cast happens inside the kernel.
    # TODO(synk): if the producer can emit logits as [C, N] directly, this
    # wrapper transpose (one extra XLA pass over x) disappears entirely.
    xT = jnp.pad(jnp.swapaxes(x, 0, 1), ((0, 0), (0, n_pad - N)))        # (C, n_pad)
    t2 = jnp.pad(target.astype(jnp.int32), (0, n_pad - N)).reshape(1, n_pad)
    w2 = per_cls_weight.astype(jnp.float32).reshape(C, 1)

    kernel = functools.partial(_ce_weight_kernel, N, tile, inner)

    num, den = pl.pallas_call(
        kernel,
        out_shape=(
            jax.ShapeDtypeStruct((num_cores, 1, tile), jnp.float32),
            jax.ShapeDtypeStruct((num_cores, 1, tile), jnp.float32),
        ),
        grid_spec=pltpu.PrefetchScalarGridSpec(
            num_scalar_prefetch=0,
            grid=(num_cores, inner),
            in_specs=[
                pl.BlockSpec((C, tile), lambda i, j: (0, i * inner + j)),  # logits tile
                pl.BlockSpec((1, tile), lambda i, j: (0, i * inner + j)),  # target tile
                pl.BlockSpec((C, 1), lambda i, j: (0, 0)),                 # class weights
            ],
            out_specs=[
                pl.BlockSpec((1, 1, tile), lambda i, j: (i, 0, 0)),        # num partials
                pl.BlockSpec((1, 1, tile), lambda i, j: (i, 0, 0)),        # den partials
            ],
        ),
        compiler_params=pltpu.CompilerParams(
            dimension_semantics=("parallel", "arbitrary")),
    )(xT, t2, w2)

    # F.cross_entropy(weight=w) mean reduction == weighted mean by w[target].
    return jnp.sum(num) / jnp.sum(den)


def _per_cls_weights(e, weight_base, f1_score, num_classes, E1=20, E2=50, E=100):
    """Replicates the epoch-dependent weight logic of CE_weight.forward."""
    if e <= E1:
        return jnp.ones((num_classes,), jnp.float32)
    if e <= E2:
        now_power = (e - E1) / (E2 - E1)
        return jnp.power(weight_base, now_power).astype(jnp.float32)
    f1 = jnp.asarray(f1_score, jnp.float32)
    w = 1.0 / f1
    w = w / jnp.sum(w) * num_classes
    now_power = (e - E2) / (E - E2)
    return jnp.power(w, now_power).astype(jnp.float32)


def ce_weight_forward(x, target, e, cls_num_list,
                      f1_score=(1, 1, 1, 1, 1, 1, 1), E1=20, E2=50, E=100):
    """Forward pass of CE_weight: weighted cross-entropy over [N, C] logits."""
    C = x.shape[1]
    cls_num = jnp.asarray(cls_num_list, jnp.float32)
    inv = 1.0 / cls_num
    weight_base = inv / jnp.sum(inv) * C     # self.weight from __init__
    per_cls = _per_cls_weights(e, weight_base, f1_score, C, E1, E2, E)
    return weighted_cross_entropy_pallas(x, target, per_cls)


def _reference(x, target, per_cls):
    logp = jax.nn.log_softmax(x.astype(jnp.float32), axis=-1)
    nll = -logp[jnp.arange(x.shape[0]), target]
    w_i = per_cls[target]
    return jnp.sum(w_i * nll) / jnp.sum(w_i)


if __name__ == "__main__":
    key = jax.random.PRNGKey(0)
    C = 7
    cls_num_list = [100.0, 50.0, 30.0, 20.0, 10.0, 5.0, 2.0]
    f1_score = [0.9, 0.8, 0.7, 0.6, 0.5, 0.4, 0.3]

    inv = 1.0 / jnp.asarray(cls_num_list, jnp.float32)
    weight_base = inv / jnp.sum(inv) * C

    # Exercise all three epoch regimes and a ragged batch size (mask path).
    for N in (16, 37):
        kx, kt, key = jax.random.split(key, 3)
        x = jax.random.normal(kx, (N, C), dtype=jnp.float32)
        target = jax.random.randint(kt, (N,), 0, C, dtype=jnp.int32)

        for e in (10, 35, 80):
            loss = ce_weight_forward(x, target, e, cls_num_list, f1_score)
            loss = jax.block_until_ready(loss)
            per_cls = _per_cls_weights(e, weight_base, f1_score, C)
            ref = _reference(x, target, per_cls)
            assert jnp.allclose(loss, ref, rtol=1e-5, atol=1e-5), (N, e, loss, ref)

    # bf16 logits: DMA'd in native dtype, cast to f32 inside the kernel.
    kx, kt, key = jax.random.split(key, 3)
    xb = jax.random.normal(kx, (16, C), dtype=jnp.float32).astype(jnp.bfloat16)
    tb = jax.random.randint(kt, (16,), 0, C, dtype=jnp.int32)
    per_cls = _per_cls_weights(35, weight_base, f1_score, C)
    loss_b = jax.block_until_ready(
        weighted_cross_entropy_pallas(xb, tb, per_cls))
    ref_b = _reference(xb.astype(jnp.float32), tb, per_cls)
    assert jnp.allclose(loss_b, ref_b, rtol=1e-4, atol=1e-4), (loss_b, ref_b)

    print("KERNEL_OK")
</pallas_src>

<mosaic_0001>
module attributes {stable_mosaic.version = 11 : i64} {
  func.func @_ce_weight_kernel(%arg0: i32, %arg1: i32, %arg2: memref<7x128xf32, #tpu.memory_space<vmem>>, %arg3: memref<1x128xi32, #tpu.memory_space<vmem>>, %arg4: memref<7x1xf32, #tpu.memory_space<vmem>>, %arg5: memref<1x1x128xf32, #tpu.memory_space<vmem>>, %arg6: memref<1x1x128xf32, #tpu.memory_space<vmem>>) attributes {dimension_semantics = [#tpu.dimension_semantics<parallel>, #tpu.dimension_semantics<arbitrary>], iteration_bounds = array<i64: 2, 1>, scalar_prefetch = 0 : i64, scratch_operands = 0 : i64, tpu.core_type = #tpu.core_type<tc>, window_params = [{transform_indices = @transform_0, window_bounds = array<i64: 7, 128>}, {transform_indices = @transform_1, window_bounds = array<i64: 1, 128>}, {pipeline_mode = #tpu.pipeline_mode<synchronous>, transform_indices = @transform_2, window_bounds = array<i64: 7, 1>}, {transform_indices = @transform_3, window_bounds = array<i64: 1, 1, 128>}, {transform_indices = @transform_4, window_bounds = array<i64: 1, 1, 128>}]} {
    %c0_i32 = arith.constant 0 : i32
    %0 = arith.cmpi eq, %arg1, %c0_i32 : i32
    %1 = arith.extui %0 : i1 to i32
    %c0_i32_0 = arith.constant 0 : i32
    %2 = arith.cmpi ne, %1, %c0_i32_0 : i32
    scf.if %2 {
      %cst_22 = arith.constant 0.000000e+00 : f32
      %47 = vector.broadcast %cst_22 : f32 to vector<1x1x128xf32>
      %c0_23 = arith.constant 0 : index
      %c0_24 = arith.constant 0 : index
      %c0_25 = arith.constant 0 : index
      %48 = vector.load %arg5[%c0_23, %c0_24, %c0_25] : memref<1x1x128xf32, #tpu.memory_space<vmem>>, vector<1x1x128xf32>
      tpu.vector_store %arg5[%c0_23, %c0_24, %c0_25], %47 {strides = array<i32>} : memref<1x1x128xf32, #tpu.memory_space<vmem>>, vector<1x1x128xf32>,
      %cst_26 = arith.constant 0.000000e+00 : f32
      %49 = vector.broadcast %cst_26 : f32 to vector<1x1x128xf32>
      %c0_27 = arith.constant 0 : index
      %c0_28 = arith.constant 0 : index
      %c0_29 = arith.constant 0 : index
      %50 = vector.load %arg6[%c0_27, %c0_28, %c0_29] : memref<1x1x128xf32, #tpu.memory_space<vmem>>, vector<1x1x128xf32>
      tpu.vector_store %arg6[%c0_27, %c0_28, %c0_29], %49 {strides = array<i32>} : memref<1x1x128xf32, #tpu.memory_space<vmem>>, vector<1x1x128xf32>,
    } else {
    }
    %c0 = arith.constant 0 : index
    %c0_1 = arith.constant 0 : index
    %3 = vector.load %arg2[%c0, %c0_1] : memref<7x128xf32, #tpu.memory_space<vmem>>, vector<7x128xf32>
    %c0_2 = arith.constant 0 : index
    %c0_3 = arith.constant 0 : index
    %4 = vector.load %arg3[%c0_2, %c0_3] : memref<1x128xi32, #tpu.memory_space<vmem>>, vector<1x128xi32>
    %c0_4 = arith.constant 0 : index
    %c0_5 = arith.constant 0 : index
    %5 = vector.load %arg4[%c0_4, %c0_5] : memref<7x1xf32, #tpu.memory_space<vmem>>, vector<7x1xf32>
    %6 = tpu.iota {dimensions = array<i32: 1>} : vector<1x128xi32>
    %c1_i32 = arith.constant 1 : i32
    %7 = arith.muli %arg0, %c1_i32 : i32
    %8 = arith.addi %7, %arg1 : i32
    %c128_i32 = arith.constant 128 : i32
    %9 = arith.muli %8, %c128_i32 : i32
    %10 = vector.broadcast %9 : i32 to vector<1x128xi32>
    %11 = arith.addi %10, %6 : vector<1x128xi32>
    %c16_i32 = arith.constant 16 : i32
    %12 = vector.broadcast %c16_i32 : i32 to vector<1x128xi32>
    %13 = arith.cmpi slt, %11, %12 : vector<1x128xi32>
    %cst = arith.constant dense<0xFF800000> : vector<128xf32>
    %14 = vector.multi_reduction <maximumf>, %3, %cst [0] : vector<7x128xf32> to vector<128xf32>
    %15 = vector.shape_cast %14 : vector<128xf32> to vector<1x128xf32>
    %16 = vector.broadcast %15 : vector<1x128xf32> to vector<7x128xf32>
    %17 = arith.subf %3, %16 : vector<7x128xf32>
    %18 = math.exp %17 : vector<7x128xf32>
    %cst_6 = arith.constant dense<0.000000e+00> : vector<128xf32>
    %19 = vector.multi_reduction <add>, %18, %cst_6 [0] : vector<7x128xf32> to vector<128xf32>
    %20 = vector.shape_cast %19 : vector<128xf32> to vector<1x128xf32>
    %21 = math.log %20 : vector<1x128xf32>
    %22 = arith.addf %15, %21 : vector<1x128xf32>
    %23 = tpu.iota {dimensions = array<i32: 0>} : vector<7x128xi32>
    %24 = vector.broadcast %4 : vector<1x128xi32> to vector<7x128xi32>
    %25 = arith.cmpi eq, %23, %24 : vector<7x128xi32>
    %26 = arith.extui %25 : vector<7x128xi1> to vector<7x128xi32>
    %27 = arith.sitofp %26 : vector<7x128xi32> to vector<7x128xf32>
    %28 = arith.mulf %3, %27 : vector<7x128xf32>
    %cst_7 = arith.constant dense<0.000000e+00> : vector<128xf32>
    %29 = vector.multi_reduction <add>, %28, %cst_7 [0] : vector<7x128xf32> to vector<128xf32>
    %30 = vector.shape_cast %29 : vector<128xf32> to vector<1x128xf32>
    %31 = vector.broadcast %5 : vector<7x1xf32> to vector<7x128xf32>
    %32 = arith.mulf %27, %31 : vector<7x128xf32>
    %cst_8 = arith.constant dense<0.000000e+00> : vector<128xf32>
    %33 = vector.multi_reduction <add>, %32, %cst_8 [0] : vector<7x128xf32> to vector<128xf32>
    %34 = vector.shape_cast %33 : vector<128xf32> to vector<1x128xf32>
    %cst_9 = arith.constant 0.000000e+00 : f32
    %35 = vector.broadcast %cst_9 : f32 to vector<1x128xf32>
    %36 = arith.select %13, %34, %35 : vector<1x128xi1>, vector<1x128xf32>
    %37 = arith.subf %22, %30 : vector<1x128xf32>
    %c0_10 = arith.constant 0 : index
    %c0_11 = arith.constant 0 : index
    %c0_12 = arith.constant 0 : index
    %38 = vector.load %arg5[%c0_10, %c0_11, %c0_12] : memref<1x1x128xf32, #tpu.memory_space<vmem>>, vector<1x1x128xf32>
    %39 = arith.mulf %36, %37 : vector<1x128xf32>
    %40 = vector.shape_cast %39 : vector<1x128xf32> to vector<1x1x128xf32>
    %41 = arith.addf %38, %40 : vector<1x1x128xf32>
    %c0_13 = arith.constant 0 : index
    %c0_14 = arith.constant 0 : index
    %c0_15 = arith.constant 0 : index
    %42 = vector.load %arg5[%c0_13, %c0_14, %c0_15] : memref<1x1x128xf32, #tpu.memory_space<vmem>>, vector<1x1x128xf32>
    tpu.vector_store %arg5[%c0_13, %c0_14, %c0_15], %41 {strides = array<i32>} : memref<1x1x128xf32, #tpu.memory_space<vmem>>, vector<1x1x128xf32>,
    %c0_16 = arith.constant 0 : index
    %c0_17 = arith.constant 0 : index
    %c0_18 = arith.constant 0 : index
    %43 = vector.load %arg6[%c0_16, %c0_17, %c0_18] : memref<1x1x128xf32, #tpu.memory_space<vmem>>, vector<1x1x128xf32>
    %44 = vector.shape_cast %36 : vector<1x128xf32> to vector<1x1x128xf32>
    %45 = arith.addf %43, %44 : vector<1x1x128xf32>
    %c0_19 = arith.constant 0 : index
    %c0_20 = arith.constant 0 : index
    %c0_21 = arith.constant 0 : index
    %46 = vector.load %arg6[%c0_19, %c0_20, %c0_21] : memref<1x1x128xf32, #tpu.memory_space<vmem>>, vector<1x1x128xf32>
    tpu.vector_store %arg6[%c0_19, %c0_20, %c0_21], %45 {strides = array<i32>} : memref<1x1x128xf32, #tpu.memory_space<vmem>>, vector<1x1x128xf32>,
    return
  }
  func.func @transform_0(%arg0: i32, %arg1: i32) -> (i32, i32) {
    %c1_i32 = arith.constant 1 : i32
    %0 = arith.muli %arg0, %c1_i32 : i32
    %1 = arith.addi %0, %arg1 : i32
    %c0_i32 = arith.constant 0 : i32
    %c0_i32_0 = arith.constant 0 : i32
    return %c0_i32, %1 : i32, i32
  }
  func.func @transform_1(%arg0: i32, %arg1: i32) -> (i32, i32) {
    %c1_i32 = arith.constant 1 : i32
    %0 = arith.muli %arg0, %c1_i32 : i32
    %1 = arith.addi %0, %arg1 : i32
    %c0_i32 = arith.constant 0 : i32
    %c0_i32_0 = arith.constant 0 : i32
    return %c0_i32, %1 : i32, i32
  }
  func.func @transform_2(%arg0: i32, %arg1: i32) -> (i32, i32) {
    %c0_i32 = arith.constant 0 : i32
    %c0_i32_0 = arith.constant 0 : i32
    %c0_i32_1 = arith.constant 0 : i32
    return %c0_i32, %c0_i32_0 : i32, i32
  }
  func.func @transform_3(%arg0: i32, %arg1: i32) -> (i32, i32, i32) {
    %c0_i32 = arith.constant 0 : i32
    %c0_i32_0 = arith.constant 0 : i32
    %c0_i32_1 = arith.constant 0 : i32
    return %arg0, %c0_i32, %c0_i32_0 : i32, i32, i32
  }
  func.func @transform_4(%arg0: i32, %arg1: i32) -> (i32, i32, i32) {
    %c0_i32 = arith.constant 0 : i32
    %c0_i32_0 = arith.constant 0 : i32
    %c0_i32_1 = arith.constant 0 : i32
    return %arg0, %c0_i32, %c0_i32_0 : i32, i32, i32
  }
}

</mosaic_0001>

<bundles_post_ra>
// kernel: weighted_cross_entropy_pallas.1
= control target key start
LH: loop header
LB: loop body
LE: loop exit
PB: predicated region body
PF: predicated region fallthrough
CT: control target
= control target key end

     0   :  { %s498_s15 = smov 0   ;;  %s500_s16 = smov 0   ;;  %s559_s0 = inlined_call_operand.vmem [shape: f32[7,256], index: 0, kind: input, shape index: {}]   ;;  %s560_s1 = inlined_call_operand.vmem [shape: s32[1,256], index: 1, kind: input, shape index: {}]   ;;  %s561_s2 = inlined_call_operand.vmem [shape: f32[7,1], index: 2, kind: input, shape index: {}]   ;;  %s562_s3 = inlined_call_operand.vmem [shape: f32[2,1,128], index: 3, kind: output, shape index: {0}]   ;;  %s563_s4 = inlined_call_operand.vmem [shape: f32[2,1,128], index: 4, kind: output, shape index: {1}]  }
   0x1   :  { %s502_s17 = smov 0  }
   0x2 LB: > { %s27_s18 = sadd.s32 1, %s465_s16  ;;  %p409_p0 = scmp.ge.s32.totalorder %s469_s17, 1  ;;  %s469_s17 = sphi %s502_s17, %s15_s17   ;;  %s465_s16 = sphi %s500_s16, %s565_s16   ;;  %s461_s15 = sphi %s498_s15, %s564_s15  }
   0x3   : > { %p29_p1 = scmp.ge.s32.totalorder %s27_s18, 2  ;;  %p192_p2 = scmp.lt.s32.totalorder %s469_s17, 3 }
   0x5   : > { %s567_s18 = smov (%p29_p1, %s27_s18), 0  ;;  %p193_p3 = pnand %p409_p0, %p192_p2 }
   0x6   : > { %p224_p4 = scmp.lt.s32.totalorder (!%p193_p3), %s461_s15, 1  ;;  %s411_s9 = sshll.u32 (!%p193_p3), %s461_s15, 7 }
   0x7   : > { %196 = sbr.rel (%p193_p3) target bundleno = 159 (0x9f), region = 32 }
   0xc   : > { %v248_v0 = vld [vmem:[%s561_s2] sm:$0x7f]  ;;  %v249_v1 = vlaneseq  ;;  %v471_v2 = vmov 0   ;;  %s225_s21 = scalar_select %p224_p4, %s461_s15, 1  ;;  %vm256_vm0 = vcmask 1046528   ;;  %v472_v5 = vmov 0.0  }
   0xd   : > { %442 = vset.pattern.permute.xlu0 %v471_v2  ;;  %v253_v42 = vstv %s411_s9 }
   0xe   : > { %296 = vperm.xlu0 %442, %v248_v0   ;;  %v278_v3 = vshrl.u32 %v249_v1, 7  ;;  %s410_s22 = sshll.u32 %s225_s21, 3  ;;  %s232_s25 = scalar_lea.vmem %s560_s1, %s225_s21  ;;  %v250_v41 = vand.u32 127, %v249_v1 }
   0xf   : > { %s227_s28 = scalar_lea.vmem %s559_s0, %s410_s22  ;;  %s532_s5 = scalar_lea.vmem %s562_s3, %s225_s21  ;;  %v412_v4 = vld [vmem:[%s232_s25] ss:$0 sm:$0xff] }
  0x10   : > { %s537_s8 = scalar_lea.vmem %s563_s4, %s225_s21  ;;  %244 = vst [vmem:[%s532_s5] sm:$0x1] %v472_v5  ;;  %v246_v6 = vld [vmem:[%s227_s28] sm:$0x7f]  ;;  %vm283_vm1 = vcmp.eq.s32.totalorder %v278_v3, %v412_v4  ;;  %v254_v45 = vadd.s32 %v253_v42, %v250_v41 }
  0x11   : > { %245 = vst [vmem:[%s537_s8] sm:$0x1] %v472_v5  ;;  %v257_v7 = vsel %vm256_vm0, %v246_v6, -inf  ;;  %v413_v8 = vsel %vm283_vm1, 1.0, %v472_v5 }
  0x12   : > { %v258_v9 = vrot.slane %v257_v7, 4  ;;  %v286_v10 = vmul.f32 %v413_v8, %v246_v6  ;;  %vm255_vm2 = vcmp.lt.s32.totalorder %v254_v45, 16 }
  0x14   : > { %v259_v11 = vmax.f32 %v257_v7, %v258_v9  ;;  %v287_v22 = vsel %vm256_vm0, %v286_v10, 0.0 }
  0x15   : > { %v288_v25 = vrot.slane %v287_v22, 4 }
  0x16   : > { %v260_v12 = vrot.slane %v259_v11, 2 }
  0x17   : > { %v289_v28 = vadd.f32 %v288_v25, %v287_v22  ;;  %v309_v51 = vld [vmem:[%s532_s5] sm:$0x1] }
  0x18   : > { %v261_v13 = vmax.f32 %v259_v11, %v260_v12  ;;  %v313_v49 = vld [vmem:[%s537_s8] sm:$0x1] }
  0x19   : > { %v290_v29 = vrot.slane %v289_v28, 2 }
  0x1a   : > { %v262_v14 = vrot.slane %v261_v13, 1 }
  0x1b   : > { %v291_v30 = vadd.f32 %v290_v29, %v289_v28 }
  0x1c   : > { %v263_v15 = vmax.f32 %v261_v13, %v262_v14 }
  0x1d   : > { %v292_v31 = vrot.slane %v291_v30, 1 }
  0x1e   : > { %v264_v16 = vsub.f32 %v246_v6, %v263_v15 }
  0x1f   : > { %v293_v34 = vadd.f32 %v292_v31, %v291_v30 }
  0x20   : > { %v265_v17 = vmul.f32 1.442695, %v264_v16 }
  0x22   : > { %443 = vpow2.f32 %v265_v17 }
  0x2f   : > { %v444_v18 = vpop.eup %443 }
  0x30   : > { %v267_v19 = vsel %vm256_vm0, %v444_v18, 0.0 }
  0x31   : > { %v268_v20 = vrot.slane %v267_v19, 4 }
  0x33   : > { %v269_v21 = vadd.f32 %v268_v20, %v267_v19 }
  0x35   : > { %v270_v23 = vrot.slane %v269_v21, 2 }
  0x37   : > { %v271_v24 = vadd.f32 %v270_v23, %v269_v21 }
  0x39   : > { %v272_v26 = vrot.slane %v271_v24, 1 }
  0x3b   : > { %v273_v27 = vadd.f32 %v272_v26, %v271_v24 }
  0x3d   : > { %445 = vlog2.f32 %v273_v27 }
  0x4a   : > { %v446_v32 = vpop.eup %445 }
  0x4b   : > { %v275_v33 = vmul.f32 0.6931472, %v446_v32 }
  0x4d   : > { %v276_v35 = vadd.f32 %v275_v33, %v263_v15 }
  0x4f   : > { %v308_v36 = vsub.f32 %v276_v35, %v293_v34 }
  0x89   : > { %v297_v37 = vpop.permute.xlu0 %296 }
  0x8a   : > { %v299_v38 = vmul.f32 %v413_v8, %v297_v37 }
  0x8c   : > { %v300_v39 = vsel %vm256_vm0, %v299_v38, 0.0 }
  0x8d   : > { %v301_v40 = vrot.slane %v300_v39, 4 }
  0x8f   : > { %v302_v43 = vadd.f32 %v301_v40, %v300_v39 }
  0x91   : > { %v303_v44 = vrot.slane %v302_v43, 2 }
  0x93   : > { %v304_v46 = vadd.f32 %v303_v44, %v302_v43 }
  0x95   : > { %v305_v47 = vrot.slane %v304_v46, 1 }
  0x97   : > { %v306_v48 = vadd.f32 %v305_v47, %v304_v46 }
  0x99   : > { %v307_v50 = vsel %vm255_vm2, %v306_v48, 0.0 }
  0x9a   : > { %v310_v52 = vmul.f32 %v308_v36, %v307_v50  ;;  %v314_v53 = vadd.f32 %v313_v49, %v307_v50 }
  0x9c   : > { %v311_v54 = vadd.f32 %v310_v52, %v309_v51  ;;  %315 = vst [vmem:[%s537_s8] sm:$0x1] %v314_v53 }
  0x9e   : > { %312 = vst [vmem:[%s532_s5] sm:$0x1] %v311_v54 }
  0x9f PF: > { %s15_s17 = sadd.s32 1, %s469_s17   ;;  %s564_s15 = smov %s465_s16 }
  0xa0   : > { %p12_p5 = scmp.ge.s32.totalorder %s15_s17, 4   ;;  %s565_s16 = smov %s567_s18 }
  0xa2   :  { %14 = sbr.rel (!%p12_p5) target bundleno = 2 (0x2), region = 81 }

</bundles_post_ra>
